<compile_context>
chip_gen: v6e
topology: v6e:2x2x1
jax: 0.10.0
libtpu: 0.0.40
codegen_flags: <defaults>
</compile_context>

<pallas_src>
import jax
import jax.numpy as jnp
from jax.experimental import pallas as pl
from jax.experimental.pallas import tpu as pltpu


def _round_up(n, m):
    return ((n + m - 1) // m) * m


def _mistral_mlp_kernel(x_ref, wg_ref, wu_ref, wd_ref, o_ref, acc_ref):
    # x_ref:   [tm, H]   token tile (resident across the I-reduction axis)
    # wg_ref:  [H, ti]   gate-proj column block
    # wu_ref:  [H, ti]   up-proj column block
    # wd_ref:  [ti, H]   down-proj row block
    # o_ref:   [tm, H]   output tile (written on the last reduction step)
    # acc_ref: [tm, H]   f32 accumulator scratch
    k = pl.program_id(1)

    @pl.when(k == 0)
    def _():
        acc_ref[...] = jnp.zeros_like(acc_ref)

    x = x_ref[...]
    gate = jnp.dot(x, wg_ref[...], preferred_element_type=jnp.float32)  # [tm, ti]
    up = jnp.dot(x, wu_ref[...], preferred_element_type=jnp.float32)    # [tm, ti]
    # SiLU in f32 (VPU muls + EUP logistic), cast back for the MXU down-proj.
    h = (gate * jax.lax.logistic(gate) * up).astype(wd_ref.dtype)
    acc_ref[...] += jnp.dot(h, wd_ref[...], preferred_element_type=jnp.float32)

    @pl.when(k == pl.num_programs(1) - 1)
    def _():
        o_ref[...] = acc_ref[...].astype(o_ref.dtype)


def mistral_mlp(x, w_gate, w_up, w_down, *, tm=256, ti=1024, vmem_limit_bytes=None):
    """MistralMLP forward.

    x:      [T, H]     activations (tokens = batch*seq flattened)
    w_gate: [H, I]     gate_proj weight, pre-transposed for right-multiply
    w_up:   [H, I]     up_proj weight, pre-transposed
    w_down: [I, H]     down_proj weight, pre-transposed
    returns [T, H]

    Tuning: v5e -> tm=128, ti multiple of 128 (e.g. 1024);
            v6e -> tm=256, ti=1024..2048, vmem_limit_bytes ~ 96 MiB;
            v7x -> tm=256, ti=512 (64 MiB VMEM budget).
    Weights should be bf16 at real sizes; x is cast to the weight dtype here
    and the output keeps x's dtype with f32 accumulation throughout.
    """
    T, H = x.shape
    Hg, I = w_gate.shape
    Hu, Iu = w_up.shape
    Id, Hd = w_down.shape
    assert H == Hg == Hu == Hd, "hidden dims must match"
    assert I == Iu == Id, "intermediate dims must match"

    compute_dtype = w_gate.dtype
    out_dtype = x.dtype

    # Token tile: clamp to (padded) token count; multiples of 16 satisfy both
    # f32 (8-row) and bf16 (16-row) sublane packing.
    tm_eff = min(tm, _round_up(T, 16))
    T_pad = _round_up(T, tm_eff)

    # Intermediate tile: whole I in one step, or a 128-multiple dividing I.
    ti_eff = min(ti, I)
    if ti_eff < I:
        assert I % ti_eff == 0 and ti_eff % 128 == 0, (
            "ti must be a multiple of 128 that divides the intermediate size")
    n_tok = T_pad // tm_eff
    n_red = I // ti_eff

    xp = x.astype(compute_dtype)
    if T_pad != T:
        xp = jnp.pad(xp, ((0, T_pad - T), (0, 0)))

    w_bytes = jnp.dtype(compute_dtype).itemsize
    cost = pl.CostEstimate(
        flops=6 * T_pad * H * I,                     # 2*T*H*2I + 2*T*I*H
        transcendentals=T_pad * I,                   # logistic
        bytes_accessed=(xp.size * xp.dtype.itemsize
                        + 3 * H * I * w_bytes
                        + T_pad * H * jnp.dtype(out_dtype).itemsize),
    )

    out = pl.pallas_call(
        _mistral_mlp_kernel,
        out_shape=jax.ShapeDtypeStruct((T_pad, H), out_dtype),
        grid_spec=pltpu.PrefetchScalarGridSpec(
            num_scalar_prefetch=0,
            grid=(n_tok, n_red),                     # reduction axis last
            in_specs=[
                pl.BlockSpec((tm_eff, H), lambda i, k: (i, 0)),   # x token tile
                pl.BlockSpec((H, ti_eff), lambda i, k: (0, k)),   # gate block
                pl.BlockSpec((H, ti_eff), lambda i, k: (0, k)),   # up block
                pl.BlockSpec((ti_eff, H), lambda i, k: (k, 0)),   # down block
            ],
            out_specs=pl.BlockSpec((tm_eff, H), lambda i, k: (i, 0)),
            scratch_shapes=[pltpu.VMEM((tm_eff, H), jnp.float32)],
        ),
        compiler_params=pltpu.CompilerParams(
            dimension_semantics=("parallel", "arbitrary"),
            vmem_limit_bytes=vmem_limit_bytes,
        ),
        cost_estimate=cost,
    )(xp, w_gate, w_up, w_down.astype(compute_dtype))

    return out[:T] if T_pad != T else out


def _reference(x, w_gate, w_up, w_down):
    gate = x @ w_gate
    up = x @ w_up
    return (jax.nn.silu(gate) * up) @ w_down


if __name__ == "__main__":
    key = jax.random.PRNGKey(0)
    k_x, k_g, k_u, k_d = jax.random.split(key, 4)

    # Small shapes consistent with the module (tokens = batch*seq flattened).
    # tokens=12 is deliberately ragged to exercise the padding path; ti=256
    # with intermediate=512 exercises the 2-step reduction/accumulator path.
    tokens, hidden, intermediate = 12, 256, 512

    x = jax.random.normal(k_x, (tokens, hidden), dtype=jnp.float32)

    # PyTorch Linear stores [out, in]; pre-transpose to [in, out] for
    # right-multiplication (same math as x @ W^T).
    w_gate = (jax.random.normal(k_g, (intermediate, hidden), jnp.float32) * 0.05).T
    w_up = (jax.random.normal(k_u, (intermediate, hidden), jnp.float32) * 0.05).T
    w_down = (jax.random.normal(k_d, (hidden, intermediate), jnp.float32) * 0.05).T

    out = mistral_mlp(x, w_gate, w_up, w_down, tm=256, ti=256)
    out = jax.block_until_ready(out)

    ref = _reference(x, w_gate, w_up, w_down)
    assert out.shape == (tokens, hidden)
    max_err = float(jnp.max(jnp.abs(out - ref)))
    assert jnp.allclose(out, ref, atol=5e-3, rtol=5e-3), (
        f"mismatch vs reference, max abs err {max_err}")

    # TODO(synk): multi-shard TensorParallelRowLinear would need an all-reduce
    # (remote DMA collective) after the down projection; single-shard only here.
    print("KERNEL_OK")
</pallas_src>

<mosaic_0001>
module attributes {stable_mosaic.version = 11 : i64} {
  func.func @_mistral_mlp_kernel(%arg0: i32, %arg1: i32, %arg2: memref<16x256xf32, #tpu.memory_space<vmem>>, %arg3: memref<256x256xf32, #tpu.memory_space<vmem>>, %arg4: memref<256x256xf32, #tpu.memory_space<vmem>>, %arg5: memref<256x256xf32, #tpu.memory_space<vmem>>, %arg6: memref<16x256xf32, #tpu.memory_space<vmem>>, %arg7: memref<16x256xf32, #tpu.memory_space<vmem>>) attributes {dimension_semantics = [#tpu.dimension_semantics<parallel>, #tpu.dimension_semantics<arbitrary>], iteration_bounds = array<i64: 1, 2>, scalar_prefetch = 0 : i64, scratch_operands = 1 : i64, tpu.core_type = #tpu.core_type<tc>, window_params = [{transform_indices = @transform_0, window_bounds = array<i64: 16, 256>}, {transform_indices = @transform_1, window_bounds = array<i64: 256, 256>}, {transform_indices = @transform_2, window_bounds = array<i64: 256, 256>}, {transform_indices = @transform_3, window_bounds = array<i64: 256, 256>}, {transform_indices = @transform_4, window_bounds = array<i64: 16, 256>}]} {
    %c0_i32 = arith.constant 0 : i32
    %0 = arith.cmpi eq, %arg1, %c0_i32 : i32
    %1 = arith.extui %0 : i1 to i32
    %c0_i32_0 = arith.constant 0 : i32
    %2 = arith.cmpi ne, %1, %c0_i32_0 : i32
    scf.if %2 {
      %cst_16 = arith.constant 0.000000e+00 : f32
      %23 = vector.broadcast %cst_16 : f32 to vector<16x256xf32>
      %c0_17 = arith.constant 0 : index
      %c0_18 = arith.constant 0 : index
      %24 = vector.load %arg7[%c0_17, %c0_18] : memref<16x256xf32, #tpu.memory_space<vmem>>, vector<16x256xf32>
      tpu.vector_store %arg7[%c0_17, %c0_18], %23 {strides = array<i32>} : memref<16x256xf32, #tpu.memory_space<vmem>>, vector<16x256xf32>,
    } else {
    }
    %c0 = arith.constant 0 : index
    %c0_1 = arith.constant 0 : index
    %3 = vector.load %arg2[%c0, %c0_1] : memref<16x256xf32, #tpu.memory_space<vmem>>, vector<16x256xf32>
    %c0_2 = arith.constant 0 : index
    %c0_3 = arith.constant 0 : index
    %4 = vector.load %arg3[%c0_2, %c0_3] : memref<256x256xf32, #tpu.memory_space<vmem>>, vector<256x256xf32>
    %cst = arith.constant dense<0.000000e+00> : vector<16x256xf32>
    %5 = tpu.matmul %3, %4, %cst {dimension_numbers = #tpu.dot_dimension_numbers<[1], [0], [0], [1], [0, 0, 1, 1], [], []>} : vector<16x256xf32>, vector<256x256xf32>, vector<16x256xf32> -> vector<16x256xf32>
    %c0_4 = arith.constant 0 : index
    %c0_5 = arith.constant 0 : index
    %6 = vector.load %arg4[%c0_4, %c0_5] : memref<256x256xf32, #tpu.memory_space<vmem>>, vector<256x256xf32>
    %cst_6 = arith.constant dense<0.000000e+00> : vector<16x256xf32>
    %7 = tpu.matmul %3, %6, %cst_6 {dimension_numbers = #tpu.dot_dimension_numbers<[1], [0], [0], [1], [0, 0, 1, 1], [], []>} : vector<16x256xf32>, vector<256x256xf32>, vector<16x256xf32> -> vector<16x256xf32>
    %8 = arith.negf %5 : vector<16x256xf32>
    %9 = math.exp %8 : vector<16x256xf32>
    %cst_7 = arith.constant 1.000000e+00 : f32
    %10 = vector.broadcast %cst_7 : f32 to vector<16x256xf32>
    %11 = arith.addf %10, %9 : vector<16x256xf32>
    %12 = arith.divf %10, %11 : vector<16x256xf32>
    %13 = arith.mulf %5, %12 : vector<16x256xf32>
    %14 = arith.mulf %13, %7 : vector<16x256xf32>
    %c0_8 = arith.constant 0 : index
    %c0_9 = arith.constant 0 : index
    %15 = vector.load %arg7[%c0_8, %c0_9] : memref<16x256xf32, #tpu.memory_space<vmem>>, vector<16x256xf32>
    %c0_10 = arith.constant 0 : index
    %c0_11 = arith.constant 0 : index
    %16 = vector.load %arg5[%c0_10, %c0_11] : memref<256x256xf32, #tpu.memory_space<vmem>>, vector<256x256xf32>
    %cst_12 = arith.constant dense<0.000000e+00> : vector<16x256xf32>
    %17 = tpu.matmul %14, %16, %cst_12 {dimension_numbers = #tpu.dot_dimension_numbers<[1], [0], [0], [1], [0, 0, 1, 1], [], []>} : vector<16x256xf32>, vector<256x256xf32>, vector<16x256xf32> -> vector<16x256xf32>
    %18 = arith.addf %15, %17 : vector<16x256xf32>
    %c0_13 = arith.constant 0 : index
    %c0_14 = arith.constant 0 : index
    %19 = vector.load %arg7[%c0_13, %c0_14] : memref<16x256xf32, #tpu.memory_space<vmem>>, vector<16x256xf32>
    tpu.vector_store %arg7[%c0_13, %c0_14], %18 {strides = array<i32>} : memref<16x256xf32, #tpu.memory_space<vmem>>, vector<16x256xf32>,
    %c1_i32 = arith.constant 1 : i32
    %20 = arith.cmpi eq, %arg1, %c1_i32 : i32
    %21 = arith.extui %20 : i1 to i32
    %c0_i32_15 = arith.constant 0 : i32
    %22 = arith.cmpi ne, %21, %c0_i32_15 : i32
    scf.if %22 {
      %c0_16 = arith.constant 0 : index
      %c0_17 = arith.constant 0 : index
      %23 = vector.load %arg7[%c0_16, %c0_17] : memref<16x256xf32, #tpu.memory_space<vmem>>, vector<16x256xf32>
      %c0_18 = arith.constant 0 : index
      %c0_19 = arith.constant 0 : index
      %24 = vector.load %arg6[%c0_18, %c0_19] : memref<16x256xf32, #tpu.memory_space<vmem>>, vector<16x256xf32>
      tpu.vector_store %arg6[%c0_18, %c0_19], %23 {strides = array<i32>} : memref<16x256xf32, #tpu.memory_space<vmem>>, vector<16x256xf32>,
    } else {
    }
    return
  }
  func.func @transform_0(%arg0: i32, %arg1: i32) -> (i32, i32) {
    %c0_i32 = arith.constant 0 : i32
    %c0_i32_0 = arith.constant 0 : i32
    return %arg0, %c0_i32 : i32, i32
  }
  func.func @transform_1(%arg0: i32, %arg1: i32) -> (i32, i32) {
    %c0_i32 = arith.constant 0 : i32
    %c0_i32_0 = arith.constant 0 : i32
    return %c0_i32, %arg1 : i32, i32
  }
  func.func @transform_2(%arg0: i32, %arg1: i32) -> (i32, i32) {
    %c0_i32 = arith.constant 0 : i32
    %c0_i32_0 = arith.constant 0 : i32
    return %c0_i32, %arg1 : i32, i32
  }
  func.func @transform_3(%arg0: i32, %arg1: i32) -> (i32, i32) {
    %c0_i32 = arith.constant 0 : i32
    %c0_i32_0 = arith.constant 0 : i32
    return %arg1, %c0_i32 : i32, i32
  }
  func.func @transform_4(%arg0: i32, %arg1: i32) -> (i32, i32) {
    %c0_i32 = arith.constant 0 : i32
    %c0_i32_0 = arith.constant 0 : i32
    return %arg0, %c0_i32 : i32, i32
  }
}

</mosaic_0001>

<bundles_post_ra>
// kernel: tpu_custom_call.1
= control target key start
LH: loop header
LB: loop body
LE: loop exit
PB: predicated region body
PF: predicated region fallthrough
CT: control target
= control target key end

     0   :  { %9 = vsyncpa [#allocation4], 0  ;;  %s1787_s0 = inlined_call_operand.hbm [shape: f32[16,256], index: 0, kind: input, shape index: {}]   ;;  %s1788_s1 = inlined_call_operand.hbm [shape: f32[256,512], index: 1, kind: input, shape index: {}]   ;;  %s1789_s2 = inlined_call_operand.hbm [shape: f32[256,512], index: 2, kind: input, shape index: {}]   ;;  %s1790_s3 = inlined_call_operand.hbm [shape: f32[512,256], index: 3, kind: input, shape index: {}]   ;;  %s1791_s4 = inlined_call_operand.hbm [shape: f32[16,256], index: 4, kind: output, shape index: {}]  }
   0x1   :  { %10 = vsyncpa [#allocation7], 0 }
   0x2   :  { %12 = vsyncpa [#allocation7 + $0x1], 0 }
   0x3   :  { %13 = vsyncpa [#allocation10], 0 }
   0x4   :  { %15 = vsyncpa [#allocation10 + $0x1], 0 }
   0x5   :  { %16 = vsyncpa [#allocation5], 0  ;;  %s1386_s15 = smov 0   ;;  %s1388_s16 = smov 0  }
   0x6   :  { %s1390_s17 = smov 0   ;;  %s1392_s18 = smov 0  }
   0x7   :  { %s1394_s19 = smov 0   ;;  %s1396_s20 = smov 0  }
   0x8 LB: > { %s31_s21 = sadd.s32 1, %s1344_s19  ;;  %s67_s22 = sadd.s32 1, %s1336_s17  ;;  %s1348_s20 = sphi %s1396_s20, %s22_s20   ;;  %s1344_s19 = sphi %s1394_s19, %s1801_s19   ;;  %s1340_s18 = sphi %s1392_s18, %s1800_s18   ;;  %s1336_s17 = sphi %s1390_s17, %s1799_s17   ;;  %s1332_s16 = sphi %s1388_s16, %s1798_s16   ;;  %s1328_s15 = sphi %s1386_s15, %s1797_s15  }
   0x9   : > { %p32_p0 = scmp.ge.s32.totalorder %s31_s21, 2  ;;  %p74_p1 = scmp.ne.s32.totalorder %s1336_s17, %s1332_s16 }
   0xa   : > { %p75_p2 = scmp.eq.s32.totalorder %s1348_s20, 0  ;;  %p1076_p5 = scmp.lt.s32.totalorder %s1348_s20, 2 }
   0xb   : > { %s1803_s21 = smov (%p32_p0, %s31_s21), 0  ;;  %s199_s25 = sand.u32 1, %s1348_s20  }
   0xc   : > { %p1423_p3 = por %p75_p2, %p74_p1  ;;  %s64_s24 = ssub.s32 %s1344_s19, %s1803_s21 }
   0xd   : > { %p65_p4 = scmp.eq.s32.totalorder %s64_s24, 0  ;;  %s201_s26 = sand.u32 1, %s1336_s17  }
   0xe   : > { %s1437_s28 = sshll.u32 %s201_s26, 9  ;;  %s979_s29 = sshll.u32 %s1344_s19, 8 }
   0xf   : > { %s1433_s27 = scalar_select %p65_p4, %s1336_s17, %s67_s22  }
  0x10   : > { %s209_s6 = scalar_lea.hbm %s1788_s1, %s979_s29  ;;  %s203_s7 = scalar_lea.vmem [#allocation6], %s1437_s28 }
  0x11   : > { %s210_s8 = sshll.u32 %s203_s7, 4  ;;  %p1446_p6 = pnand %p1076_p5, %p1423_p3  ;;  %s211_s8 = int_to_ptr.vmem [resolvable:$true] %s210_s8 }
  0x12   : > { %s1453_s12 = scalar_lea.hbm %s1789_s2, %s979_s29  ;;  %s1455_s13 = scalar_lea.sflag [#allocation7], %s199_s25 }
  0x13   : > { %p1154_p7 = pneg %p1446_p6  ;;  %s1165_s14 = scalar_lea.vmem %s211_s8, 8192 }
  0x14   : > { %p1166_p8 = scmp.ne.s32.totalorder %s211_s8, %s1165_s14  ;;  %s1350_s22 = smov [#allocation6]  }
  0x15   : > { %s1170_s23 = sshll.u32 %s1350_s22, 4  ;;  %s1171_s23 = int_to_ptr.vmem [resolvable:$false] %s1170_s23 }
  0x16   : > { %p1168_p9 = pnand %p1166_p8, %p1154_p7  ;;  %s1172_s24 = scalar_lea.vmem %s1171_s23, 16384 }
  0x17   : > { %p1173_p11 = scmp.lt.s32.totalorder %s211_s8, %s1171_s23  ;;  %p1174_p12 = scmp.lt.s32.totalorder %s1172_s24, %s1165_s14 }
  0x18   : > { %p1169_p10 = pneg %p1168_p9 }
  0x19   : > { %p1175_p13 = por %p1174_p12, %p1173_p11 }
  0x1b   : > { %p1176_p0 = pnand %p1175_p13, %p1169_p10 }
  0x1d   : > { %1179 = shalt.err (!%p1176_p0)
}
  0x1e   : > { %s1351_s29 = smov 512   ;;  %s1352_s25 = smov 256  }
  0x1f   : > { %s1353_s30 = smov 16   ;;  %s1469_s5 = sadd.s32 4294967295, %s1348_s20  }
  0x20   : > { %1068 = dma.hbm_to_vmem [thread:$0]  (!%p1446_p6), %s209_s6, 8192, %s211_s8, %s1455_s13, %s1351_s29, %s1352_s25, %s1353_s30  }
  0x21   : > { %p80_p1 = scmp.ne.s32.totalorder %s1332_s16, %s1328_s15  ;;  %p81_p2 = scmp.eq.s32.totalorder %s1469_s5, 0 }
  0x22   : > { %p951_p3 = scmp.ge.s32.totalorder %s1348_s20, 1  ;;  %p169_p4 = scmp.lt.s32.totalorder %s1348_s20, 3 }
  0x23   : > { %p1478_p5 = por %p81_p2, %p80_p1  ;;  %s1354_s6 = smov [#allocation3]  }
  0x24   : > { %p1482_p8 = pnand %p951_p3, %p169_p4  ;;  %s185_s8 = sshll.u32 %s1354_s6, 4  ;;  %s1488_s8 = int_to_ptr.vmem [resolvable:$true] %s185_s8 }
  0x25   : > { %s224_s15 = scalar_lea.vmem [#allocation8], %s1437_s28  ;;  %s1355_s23 = smov [#allocation8]  }
  0x26   : > { %p1061_p9 = pneg %p1482_p8  ;;  %s231_s11 = sshll.u32 %s224_s15, 4  ;;  %s232_s11 = int_to_ptr.vmem [resolvable:$true] %s231_s11 }
  0x27   : > { %s1193_s22 = scalar_lea.vmem %s232_s11, 8192  ;;  %s1198_s24 = sshll.u32 %s1355_s23, 4  ;;  %s1199_s24 = int_to_ptr.vmem [resolvable:$false] %s1198_s24 }
  0x28   : > { %p1493_p10 = pnand %p1061_p9, %p81_p2  ;;  %p1194_p11 = scmp.ne.s32.totalorder %s232_s11, %s1193_s22 }
  0x29   : > { %s1200_s6 = scalar_lea.vmem %s1199_s24, 16384  ;;  %p1201_p0 = scmp.lt.s32.totalorder %s232_s11, %s1199_s24 }
  0x2a   : > { %p1196_p12 = pnand %p1194_p11, %p1154_p7  ;;  %p1202_p1 = scmp.lt.s32.totalorder %s1200_s6, %s1193_s22 }
  0x2c   : > { %p1197_p13 = pneg %p1196_p12  ;;  %p1203_p3 = por %p1202_p1, %p1201_p0 }
  0x2e   : > { %p1204_p4 = pnand %p1203_p3, %p1197_p13 }
  0x30   : > { %1207 = shalt.err (!%p1204_p4)
}
  0x31   : > { %1071 = dma.hbm_to_vmem [thread:$0]  (!%p1446_p6), %s1453_s12, 8192, %s232_s11, %s1455_s13, %s1351_s29, %s1352_s25, %s1353_s30  }
  0x32   : > { %p1210_p9 = pneg %p1493_p10  ;;  %s1219_s15 = scalar_lea.vmem %s1488_s8, 512 }
  0x33   : > { %p1220_p11 = scmp.ne.s32.totalorder %s1488_s8, %s1219_s15  ;;  %p1227_p13 = scmp.lt.s32.totalorder %s1488_s8, %s1488_s8 }
  0x34   : > { %p1228_p1 = scmp.lt.s32.totalorder %s1219_s15, %s1219_s15 }
  0x35   : > { %p1222_p12 = pnand %p1220_p11, %p1210_p9 }
  0x36   : > { %p1229_p3 = por %p1228_p1, %p1227_p13 }
  0x37   : > { %p1223_p0 = pneg %p1222_p12 }
  0x39   : > { %p1230_p4 = pnand %p1229_p3, %p1223_p0 }
  0x3b   : > { %1233 = shalt.err (!%p1230_p4)
}
  0x3c   : > { %1064 = dma.hbm_to_vmem [thread:$0]  (!%p1493_p10), %s1787_s0, 512, %s1488_s8, [#allocation4], %s1352_s25, %s1352_s25, %s1353_s30  }
  0x3d   : > { %s982_s13 = sshll.u32 %s1344_s19, 13  ;;  %s245_s29 = scalar_lea.vmem [#allocation9], %s1437_s28 }
  0x3e   : > { %s253_s11 = sshll.u32 %s245_s29, 4  ;;  %s252_s6 = scalar_lea.hbm %s1790_s3, %s982_s13  ;;  %s254_s11 = int_to_ptr.vmem [resolvable:$true] %s253_s11 }
  0x3f   : > { %s242_s14 = scalar_lea.sflag [#allocation10], %s201_s26  ;;  %s1247_s15 = scalar_lea.vmem %s254_s11, 8192 }
  0x40   : > { %p1248_p9 = scmp.ne.s32.totalorder %s254_s11, %s1247_s15  ;;  %s1356_s22 = smov [#allocation9]  }
  0x41   : > { %s1252_s12 = sshll.u32 %s1356_s22, 4  ;;  %s1253_s12 = int_to_ptr.vmem [resolvable:$false] %s1252_s12 }
  0x42   : > { %p1250_p11 = pnand %p1248_p9, %p1154_p7  ;;  %s1254_s8 = scalar_lea.vmem %s1253_s12, 16384 }
  0x43   : > { %p1255_p10 = scmp.lt.s32.totalorder %s254_s11, %s1253_s12  ;;  %p1256_p0 = scmp.lt.s32.totalorder %s1254_s8, %s1247_s15 }
  0x44   : > { %p1251_p12 = pneg %p1250_p11 }
  0x45   : > { %p1257_p13 = por %p1256_p0, %p1255_p10 }
  0x47   : > { %p1258_p1 = pnand %p1257_p13, %p1251_p12 }
  0x49   : > { %1261 = shalt.err (!%p1258_p1)
}
  0x4a   : > { %1074 = dma.hbm_to_vmem [thread:$0]  (!%p1446_p6), %s252_s6, 8192, %s254_s11, %s242_s14, %s1352_s25, %s1352_s25, %s1353_s30  }
  0x4b   : > { %265 = sbr.rel (%p1482_p8) target bundleno = 621 (0x26d), region = 36 }
  0x50   : > { %1311 = dma.done.wait (%p81_p2), [#allocation4], 512  }
  0x51   : > { %1313 = vsyncadd (%p81_p2), [#allocation4], 4294966784  ;;  %s271_s26 = sand.u32 1, %s1469_s5   ;;  %s273_s28 = sand.u32 1, %s1332_s16  }
  0x52   : > { %s966_s13 = sshll.u32 %s273_s28, 9  ;;  %s272_s9 = scalar_lea.sflag [#allocation7], %s271_s26 }
  0x53   : > { %s1545_s29 = scalar_lea.vmem [#allocation6], %s966_s13 }
  0x54   : > { %1315 = dma.done.wait (%p1478_p5), %s272_s9, 16384  }
  0x55   : > { %1317 = vsyncadd (%p1478_p5), %s272_s9, 4294950912  ;;  %s1551_s25 = scalar_lea.vmem [#allocation8], %s966_s13  ;;  %s290_s30 = scalar_lea.sflag [#allocation10], %s273_s28 }
  0x56   : > { %s1553_s10 = scalar_lea.vmem [#allocation9], %s966_s13 }
  0x57   : > { %1319 = dma.done.wait (%p1478_p5), %s290_s30, 8192  }
  0x58   : > { %1321 = vsyncadd (%p1478_p5), %s290_s30, 4294959104  ;;  %p969_p6 = scmp.ne.s32.totalorder %s1340_s18, 0 }
  0x5a   : > { %331 = sbr.rel (%p969_p6) target bundleno = 98 (0x62), region = 56 }
  0x5f   : > { %v1357_v0 = vmov 0.0  }
  0x60   : > { %332 = vst [vmem:[#allocation2 + $0x10] sm:$0xff] %v1357_v0  ;;  %333 = vst [vmem:[#allocation2] sm:$0xff] %v1357_v0 }
  0x61   : > { %334 = vst [vmem:[#allocation2 + $0x18] sm:$0xff] %v1357_v0  ;;  %335 = vst [vmem:[#allocation2 + $0x8] sm:$0xff] %v1357_v0 }
  0x62 PF: > { %v371_v1 = vld [vmem:[%s1545_s29 + $0xf8] sm:$0xff]  ;;  %v370_v2 = vld [vmem:[%s1545_s29 + $0xf0] sm:$0xff]  ;;  %v369_v3 = vld [vmem:[%s1545_s29 + $0xe8] sm:$0xff]  ;;  %p974_p7 = scmp.ne.s32.totalorder %s1340_s18, 1 }
  0x63   : > { %404 = vmatprep.subr.mxu0 %v371_v1  ;;  %v368_v4 = vld [vmem:[%s1545_s29 + $0xe0] sm:$0xff]  ;;  %v367_v5 = vld [vmem:[%s1545_s29 + $0xd8] sm:$0xff]  ;;  %v366_v6 = vld [vmem:[%s1545_s29 + $0xd0] sm:$0xff] }
  0x64   : > { %405 = vmatpush1.msra.mxu0 %v370_v2  ;;  %v365_v7 = vld [vmem:[%s1545_s29 + $0xc8] sm:$0xff]  ;;  %v364_v8 = vld [vmem:[%s1545_s29 + $0xc0] sm:$0xff]  ;;  %v363_v9 = vld [vmem:[%s1545_s29 + $0xb8] sm:$0xff] }
  0x65   : > { %406 = vmatprep.subr.mxu0 %v369_v3  ;;  %v362_v10 = vld [vmem:[%s1545_s29 + $0xb0] sm:$0xff]  ;;  %v361_v11 = vld [vmem:[%s1545_s29 + $0xa8] sm:$0xff]  ;;  %v360_v12 = vld [vmem:[%s1545_s29 + $0xa0] sm:$0xff] }
  0x66   : > { %407 = vmatpush1.msra.mxu0 %v368_v4  ;;  %v359_v13 = vld [vmem:[%s1545_s29 + $0x98] sm:$0xff]  ;;  %v358_v14 = vld [vmem:[%s1545_s29 + $0x90] sm:$0xff]  ;;  %v357_v17 = vld [vmem:[%s1545_s29 + $0x88] sm:$0xff] }
  0x67   : > { %408 = vmatprep.subr.mxu0 %v367_v5  ;;  %v512_v15 = vld [vmem:[%s1551_s25 + $0xf8] sm:$0xff]  ;;  %v511_v16 = vld [vmem:[%s1551_s25 + $0xf0] sm:$0xff]  ;;  %v510_v18 = vld [vmem:[%s1551_s25 + $0xe8] sm:$0xff] }
  0x68   : > { %409 = vmatpush1.msra.mxu0 %v366_v6  ;;  %545 = vmatprep.subr.mxu1 %v512_v15  ;;  %v356_v19 = vld [vmem:[%s1545_s29 + $0x80] sm:$0xff]  ;;  %v508_v21 = vld [vmem:[%s1551_s25 + $0xd8] sm:$0xff]  ;;  %v507_v23 = vld [vmem:[%s1551_s25 + $0xd0] sm:$0xff] }
  0x69   : > { %410 = vmatprep.subr.mxu0 %v365_v7  ;;  %546 = vmatpush1.msra.mxu1 %v511_v16  ;;  %v509_v20 = vld [vmem:[%s1551_s25 + $0xe0] sm:$0xff]  ;;  %v355_v22 = vld [vmem:[%s1545_s29 + $0x78] sm:$0xff]  ;;  %v354_v24 = vld [vmem:[%s1545_s29 + $0x70] sm:$0xff] }
  0x6a   : > { %411 = vmatpush1.msra.mxu0 %v364_v8  ;;  %547 = vmatprep.subr.mxu1 %v510_v18  ;;  %v506_v25 = vld [vmem:[%s1551_s25 + $0xc8] sm:$0xff]  ;;  %v505_v27 = vld [vmem:[%s1551_s25 + $0xc0] sm:$0xff]  ;;  %v504_v29 = vld [vmem:[%s1551_s25 + $0xb8] sm:$0xff] }
  0x6b   : > { %412 = vmatprep.subr.mxu0 %v363_v9  ;;  %548 = vmatpush1.msra.mxu1 %v509_v20  ;;  %v353_v26 = vld [vmem:[%s1545_s29 + $0x68] sm:$0xff]  ;;  %v352_v28 = vld [vmem:[%s1545_s29 + $0x60] sm:$0xff]  ;;  %v351_v30 = vld [vmem:[%s1545_s29 + $0x58] sm:$0xff] }
  0x6c   : > { %413 = vmatpush1.msra.mxu0 %v362_v10  ;;  %549 = vmatprep.subr.mxu1 %v508_v21  ;;  %v503_v31 = vld [vmem:[%s1551_s25 + $0xb0] sm:$0xff]  ;;  %v502_v33 = vld [vmem:[%s1551_s25 + $0xa8] sm:$0xff]  ;;  %v501_v35 = vld [vmem:[%s1551_s25 + $0xa0] sm:$0xff] }
  0x6d   : > { %414 = vmatprep.subr.mxu0 %v361_v11  ;;  %550 = vmatpush1.msra.mxu1 %v507_v23  ;;  %v350_v32 = vld [vmem:[%s1545_s29 + $0x50] sm:$0xff]  ;;  %v349_v34 = vld [vmem:[%s1545_s29 + $0x48] sm:$0xff]  ;;  %v348_v36 = vld [vmem:[%s1545_s29 + $0x40] sm:$0xff] }
  0x6e   : > { %415 = vmatpush1.msra.mxu0 %v360_v12  ;;  %551 = vmatprep.subr.mxu1 %v506_v25  ;;  %v500_v37 = vld [vmem:[%s1551_s25 + $0x98] sm:$0xff]  ;;  %v499_v39 = vld [vmem:[%s1551_s25 + $0x90] sm:$0xff]  ;;  %v498_v41 = vld [vmem:[%s1551_s25 + $0x88] sm:$0xff] }
  0x6f   : > { %416 = vmatprep.subr.mxu0 %v359_v13  ;;  %552 = vmatpush1.msra.mxu1 %v505_v27  ;;  %v347_v38 = vld [vmem:[%s1545_s29 + $0x38] sm:$0xff]  ;;  %v346_v40 = vld [vmem:[%s1545_s29 + $0x30] sm:$0xff]  ;;  %v345_v42 = vld [vmem:[%s1545_s29 + $0x28] sm:$0xff] }
  0x70   : > { %417 = vmatpush1.msra.mxu0 %v358_v14  ;;  %553 = vmatprep.subr.mxu1 %v504_v29  ;;  %v497_v43 = vld [vmem:[%s1551_s25 + $0x80] sm:$0xff]  ;;  %v496_v45 = vld [vmem:[%s1551_s25 + $0x78] sm:$0xff]  ;;  %v495_v47 = vld [vmem:[%s1551_s25 + $0x70] sm:$0xff] }
  0x71   : > { %418 = vmatprep.subr.mxu0 %v357_v17  ;;  %554 = vmatpush1.msra.mxu1 %v503_v31  ;;  %v344_v44 = vld [vmem:[%s1545_s29 + $0x20] sm:$0xff]  ;;  %v343_v46 = vld [vmem:[%s1545_s29 + $0x18] sm:$0xff]  ;;  %v342_v48 = vld [vmem:[%s1545_s29 + $0x10] sm:$0xff] }
  0x72   : > { %419 = vmatpush1.msra.mxu0 %v356_v19  ;;  %555 = vmatprep.subr.mxu1 %v502_v33  ;;  %v494_v49 = vld [vmem:[%s1551_s25 + $0x68] sm:$0xff]  ;;  %v493_v51 = vld [vmem:[%s1551_s25 + $0x60] sm:$0xff]  ;;  %v492_v53 = vld [vmem:[%s1551_s25 + $0x58] sm:$0xff] }
  0x73   : > { %420 = vmatprep.subr.mxu0 %v355_v22  ;;  %556 = vmatpush1.msra.mxu1 %v501_v35  ;;  %v341_v50 = vld [vmem:[%s1545_s29 + $0x8] sm:$0xff]  ;;  %v340_v52 = vld [vmem:[%s1545_s29] sm:$0xff]  ;;  %v403_v54 = vld [vmem:[%s1545_s29 + $0x1f8] sm:$0xff] }
  0x74   : > { %421 = vmatpush1.msra.mxu0 %v354_v24  ;;  %557 = vmatprep.subr.mxu1 %v500_v37  ;;  %v491_v55 = vld [vmem:[%s1551_s25 + $0x50] sm:$0xff]  ;;  %v490_v57 = vld [vmem:[%s1551_s25 + $0x48] sm:$0xff]  ;;  %v489_v59 = vld [vmem:[%s1551_s25 + $0x40] sm:$0xff] }
  0x75   : > { %422 = vmatprep.subr.mxu0 %v353_v26  ;;  %558 = vmatpush1.msra.mxu1 %v499_v39  ;;  %v402_v56 = vld [vmem:[%s1545_s29 + $0x1f0] sm:$0xff]  ;;  %v401_v58 = vld [vmem:[%s1545_s29 + $0x1e8] sm:$0xff]  ;;  %v400_v60 = vld [vmem:[%s1545_s29 + $0x1e0] sm:$0xff] }
  0x76   : > { %423 = vmatpush1.msra.mxu0 %v352_v28  ;;  %559 = vmatprep.subr.mxu1 %v498_v41  ;;  %v488_v61 = vld [vmem:[%s1551_s25 + $0x38] sm:$0xff]  ;;  %v487_v63 = vld [vmem:[%s1551_s25 + $0x30] sm:$0xff]  ;;  %v486_v1 = vld [vmem:[%s1551_s25 + $0x28] sm:$0xff] }
  0x77   : > { %424 = vmatprep.subr.mxu0 %v351_v30  ;;  %560 = vmatpush1.msra.mxu1 %v497_v43  ;;  %v399_v62 = vld [vmem:[%s1545_s29 + $0x1d8] sm:$0xff]  ;;  %v398_v0 = vld [vmem:[%s1545_s29 + $0x1d0] sm:$0xff]  ;;  %v397_v2 = vld [vmem:[%s1545_s29 + $0x1c8] sm:$0xff] }
  0x78   : > { %425 = vmatpush1.msra.mxu0 %v350_v32  ;;  %561 = vmatprep.subr.mxu1 %v496_v45  ;;  %v485_v3 = vld [vmem:[%s1551_s25 + $0x20] sm:$0xff]  ;;  %v484_v5 = vld [vmem:[%s1551_s25 + $0x18] sm:$0xff]  ;;  %v483_v7 = vld [vmem:[%s1551_s25 + $0x10] sm:$0xff] }
  0x79   : > { %426 = vmatprep.subr.mxu0 %v349_v34  ;;  %562 = vmatpush1.msra.mxu1 %v495_v47  ;;  %v396_v4 = vld [vmem:[%s1545_s29 + $0x1c0] sm:$0xff]  ;;  %v395_v6 = vld [vmem:[%s1545_s29 + $0x1b8] sm:$0xff]  ;;  %v394_v8 = vld [vmem:[%s1545_s29 + $0x1b0] sm:$0xff] }
  0x7a   : > { %427 = vmatpush1.msra.mxu0 %v348_v36  ;;  %563 = vmatprep.subr.mxu1 %v494_v49  ;;  %v482_v9 = vld [vmem:[%s1551_s25 + $0x8] sm:$0xff]  ;;  %v392_v12 = vld [vmem:[%s1545_s29 + $0x1a0] sm:$0xff]  ;;  %v391_v14 = vld [vmem:[%s1545_s29 + $0x198] sm:$0xff] }
  0x7b   : > { %428 = vmatprep.subr.mxu0 %v347_v38  ;;  %564 = vmatpush1.msra.mxu1 %v493_v51  ;;  %v393_v10 = vld [vmem:[%s1545_s29 + $0x1a8] sm:$0xff]  ;;  %v481_v13 = vld [vmem:[%s1551_s25] sm:$0xff]  ;;  %v544_v15 = vld [vmem:[%s1551_s25 + $0x1f8] sm:$0xff] }
  0x7c   : > { %429 = vmatpush1.msra.mxu0 %v346_v40  ;;  %565 = vmatprep.subr.mxu1 %v492_v53  ;;  %v1634_v11 = vld [vmem:[#allocation3 + $0x8] sm:$0xff]  ;;  %v390_v16 = vld [vmem:[%s1545_s29 + $0x190] sm:$0xff]  ;;  %v388_v20 = vld [vmem:[%s1545_s29 + $0x180] sm:$0xff] }
  0x7d   : > { %430 = vmatprep.subr.mxu0 %v345_v42  ;;  %566 = vmatpush1.msra.mxu1 %v491_v55  ;;  %v543_v17 = vld [vmem:[%s1551_s25 + $0x1f0] sm:$0xff]  ;;  %v389_v18 = vld [vmem:[%s1545_s29 + $0x188] sm:$0xff]  ;;  %v541_v21 = vld [vmem:[%s1551_s25 + $0x1e0] sm:$0xff] }
  0x7e   : > { %431 = vmatpush1.msra.mxu0 %v344_v44  ;;  %567 = vmatprep.subr.mxu1 %v490_v57  ;;  %v542_v19 = vld [vmem:[%s1551_s25 + $0x1e8] sm:$0xff]  ;;  %v387_v22 = vld [vmem:[%s1545_s29 + $0x178] sm:$0xff]  ;;  %v386_v24 = vld [vmem:[%s1545_s29 + $0x170] sm:$0xff] }
  0x7f   : > { %432 = vmatprep.subr.mxu0 %v343_v46  ;;  %568 = vmatpush1.msra.mxu1 %v489_v59  ;;  %v540_v23 = vld [vmem:[%s1551_s25 + $0x1d8] sm:$0xff]  ;;  %v539_v25 = vld [vmem:[%s1551_s25 + $0x1d0] sm:$0xff]  ;;  %v385_v26 = vld [vmem:[%s1545_s29 + $0x168] sm:$0xff] }
  0x80   : > { %433 = vmatpush1.msra.mxu0 %v342_v48  ;;  %569 = vmatprep.subr.mxu1 %v488_v61  ;;  %v538_v27 = vld [vmem:[%s1551_s25 + $0x1c8] sm:$0xff]  ;;  %v384_v28 = vld [vmem:[%s1545_s29 + $0x160] sm:$0xff]  ;;  %v383_v30 = vld [vmem:[%s1545_s29 + $0x158] sm:$0xff] }
  0x81   : > { %434 = vmatprep.subr.mxu0 %v341_v50  ;;  %570 = vmatpush1.msra.mxu1 %v487_v63  ;;  %v537_v29 = vld [vmem:[%s1551_s25 + $0x1c0] sm:$0xff]  ;;  %v536_v31 = vld [vmem:[%s1551_s25 + $0x1b8] sm:$0xff]  ;;  %v382_v32 = vld [vmem:[%s1545_s29 + $0x150] sm:$0xff] }
  0x82   : > { %435 = vmatpush1.msra.mxu0 %v340_v52  ;;  %571 = vmatprep.subr.mxu1 %v486_v1  ;;  %v535_v33 = vld [vmem:[%s1551_s25 + $0x1b0] sm:$0xff]  ;;  %v381_v34 = vld [vmem:[%s1545_s29 + $0x148] sm:$0xff]  ;;  %v380_v36 = vld [vmem:[%s1545_s29 + $0x140] sm:$0xff] }
  0x83   : > { %436 = vmatprep.subr.mxu0 %v403_v54  ;;  %572 = vmatpush1.msra.mxu1 %v485_v3  ;;  %v534_v35 = vld [vmem:[%s1551_s25 + $0x1a8] sm:$0xff]  ;;  %v533_v37 = vld [vmem:[%s1551_s25 + $0x1a0] sm:$0xff]  ;;  %v379_v38 = vld [vmem:[%s1545_s29 + $0x138] sm:$0xff] }
  0x84   : > { %437 = vmatpush2.msra.mxu0 %v402_v56  ;;  %573 = vmatprep.subr.mxu1 %v484_v5  ;;  %v532_v39 = vld [vmem:[%s1551_s25 + $0x198] sm:$0xff]  ;;  %v378_v40 = vld [vmem:[%s1545_s29 + $0x130] sm:$0xff]  ;;  %v377_v42 = vld [vmem:[%s1545_s29 + $0x128] sm:$0xff] }
  0x85   : > { %438 = vmatprep.subr.mxu0 %v401_v58  ;;  %574 = vmatpush1.msra.mxu1 %v483_v7  ;;  %v531_v41 = vld [vmem:[%s1551_s25 + $0x190] sm:$0xff]  ;;  %v530_v43 = vld [vmem:[%s1551_s25 + $0x188] sm:$0xff]  ;;  %v376_v44 = vld [vmem:[%s1545_s29 + $0x120] sm:$0xff] }
  0x86   : > { %439 = vmatpush2.msra.mxu0 %v400_v60  ;;  %575 = vmatprep.subr.mxu1 %v482_v9  ;;  %v529_v45 = vld [vmem:[%s1551_s25 + $0x180] sm:$0xff]  ;;  %v375_v46 = vld [vmem:[%s1545_s29 + $0x118] sm:$0xff]  ;;  %v374_v48 = vld [vmem:[%s1545_s29 + $0x110] sm:$0xff] }
  0x87   : > { %440 = vmatprep.subr.mxu0 %v399_v62  ;;  %468 = vmatprep.mubr.f32.mxu0 %v1634_v11  ;;  %v528_v47 = vld [vmem:[%s1551_s25 + $0x178] sm:$0xff]  ;;  %v527_v49 = vld [vmem:[%s1551_s25 + $0x170] sm:$0xff]  ;;  %v373_v50 = vld [vmem:[%s1545_s29 + $0x108] sm:$0xff] }
  0x88   : > { %441 = vmatpush2.msra.mxu0 %v398_v0  ;;  %576 = vmatpush1.msra.mxu1 %v481_v13  ;;  %v526_v51 = vld [vmem:[%s1551_s25 + $0x168] sm:$0xff]  ;;  %v372_v52 = vld [vmem:[%s1545_s29 + $0x100] sm:$0xff]  ;;  %v524_v55 = vld [vmem:[%s1551_s25 + $0x158] sm:$0xff] }
  0x89   : > { %442 = vmatprep.subr.mxu0 %v397_v2  ;;  %577 = vmatprep.subr.mxu1 %v544_v15  ;;  %v525_v53 = vld [vmem:[%s1551_s25 + $0x160] sm:$0xff]  ;;  %v339_v56 = vld [vmem:[#allocation3 + $0x18] sm:$0xff]  ;;  %v523_v57 = vld [vmem:[%s1551_s25 + $0x150] sm:$0xff] }
  0x8a   : > { %443 = vmatpush2.msra.mxu0 %v396_v4  ;;  %578 = vmatpush2.msra.mxu1 %v543_v17  ;;  %v336_v54 = vld [vmem:[#allocation3] sm:$0xff]  ;;  %v522_v58 = vld [vmem:[%s1551_s25 + $0x148] sm:$0xff]  ;;  %v689_v60 = vld [vmem:[%s1553_s10 + $0xf8] sm:$0xff] }
  0x8b   : > { %444 = vmatprep.subr.mxu0 %v395_v6  ;;  %579 = vmatprep.subr.mxu1 %v542_v19  ;;  %v521_v59 = vld [vmem:[%s1551_s25 + $0x140] sm:$0xff]  ;;  %v338_v61 = vld [vmem:[#allocation3 + $0x10] sm:$0xff]  ;;  %v520_v62 = vld [vmem:[%s1551_s25 + $0x138] sm:$0xff] }
  0x8c   : > { %445 = vmatpush2.msra.mxu0 %v394_v8  ;;  %580 = vmatpush2.msra.mxu1 %v541_v21  ;;  %v519_v63 = vld [vmem:[%s1551_s25 + $0x130] sm:$0xff]  ;;  %v518_v1 = vld [vmem:[%s1551_s25 + $0x128] sm:$0xff]  ;;  %v517_v3 = vld [vmem:[%s1551_s25 + $0x120] sm:$0xff] }
  0x8d   : > { %446 = vmatprep.subr.mxu0 %v393_v10  ;;  %581 = vmatprep.subr.mxu1 %v540_v23  ;;  %v688_v0 = vld [vmem:[%s1553_s10 + $0xf0] sm:$0xff]  ;;  %v687_v2 = vld [vmem:[%s1553_s10 + $0xe8] sm:$0xff]  ;;  %v686_v4 = vld [vmem:[%s1553_s10 + $0xe0] sm:$0xff] }
  0x8e   : > { %447 = vmatpush2.msra.mxu0 %v392_v12  ;;  %582 = vmatpush2.msra.mxu1 %v539_v25  ;;  %v516_v5 = vld [vmem:[%s1551_s25 + $0x118] sm:$0xff]  ;;  %v515_v7 = vld [vmem:[%s1551_s25 + $0x110] sm:$0xff]  ;;  %v514_v9 = vld [vmem:[%s1551_s25 + $0x108] sm:$0xff] }
  0x8f   : > { %448 = vmatprep.subr.mxu0 %v391_v14  ;;  %583 = vmatprep.subr.mxu1 %v538_v27  ;;  %v685_v6 = vld [vmem:[%s1553_s10 + $0xd8] sm:$0xff]  ;;  %v684_v8 = vld [vmem:[%s1553_s10 + $0xd0] sm:$0xff]  ;;  %v683_v10 = vld [vmem:[%s1553_s10 + $0xc8] sm:$0xff] }
  0x90   : > { %449 = vmatpush2.msra.mxu0 %v390_v16  ;;  %584 = vmatpush2.msra.mxu1 %v537_v29  ;;  %v682_v12 = vld [vmem:[%s1553_s10 + $0xc0] sm:$0xff]  ;;  %v681_v13 = vld [vmem:[%s1553_s10 + $0xb8] sm:$0xff]  ;;  %v680_v14 = vld [vmem:[%s1553_s10 + $0xb0] sm:$0xff] }
  0x91   : > { %450 = vmatprep.subr.mxu0 %v389_v18  ;;  %585 = vmatprep.subr.mxu1 %v536_v31  ;;  %v679_v15 = vld [vmem:[%s1553_s10 + $0xa8] sm:$0xff]  ;;  %v678_v16 = vld [vmem:[%s1553_s10 + $0xa0] sm:$0xff]  ;;  %v677_v17 = vld [vmem:[%s1553_s10 + $0x98] sm:$0xff] }
  0x92   : > { %451 = vmatpush2.msra.mxu0 %v388_v20  ;;  %586 = vmatpush2.msra.mxu1 %v535_v33  ;;  %v676_v18 = vld [vmem:[%s1553_s10 + $0x90] sm:$0xff]  ;;  %v675_v19 = vld [vmem:[%s1553_s10 + $0x88] sm:$0xff]  ;;  %v674_v20 = vld [vmem:[%s1553_s10 + $0x80] sm:$0xff] }
  0x93   : > { %452 = vmatprep.subr.mxu0 %v387_v22  ;;  %587 = vmatprep.subr.mxu1 %v534_v35  ;;  %v673_v21 = vld [vmem:[%s1553_s10 + $0x78] sm:$0xff]  ;;  %v672_v22 = vld [vmem:[%s1553_s10 + $0x70] sm:$0xff]  ;;  %v671_v23 = vld [vmem:[%s1553_s10 + $0x68] sm:$0xff] }
  0x94   : > { %453 = vmatpush2.msra.mxu0 %v386_v24  ;;  %588 = vmatpush2.msra.mxu1 %v533_v37  ;;  %v670_v24 = vld [vmem:[%s1553_s10 + $0x60] sm:$0xff]  ;;  %v669_v25 = vld [vmem:[%s1553_s10 + $0x58] sm:$0xff]  ;;  %v667_v27 = vld [vmem:[%s1553_s10 + $0x48] sm:$0xff] }
  0x95   : > { %454 = vmatprep.subr.mxu0 %v385_v26  ;;  %589 = vmatprep.subr.mxu1 %v532_v39  ;;  %v668_v26 = vld [vmem:[%s1553_s10 + $0x50] sm:$0xff]  ;;  %v665_v29 = vld [vmem:[%s1553_s10 + $0x38] sm:$0xff]  ;;  %v663_v31 = vld [vmem:[%s1553_s10 + $0x28] sm:$0xff] }
  0x96   : > { %455 = vmatpush2.msra.mxu0 %v384_v28  ;;  %590 = vmatpush2.msra.mxu1 %v531_v41  ;;  %v666_v28 = vld [vmem:[%s1553_s10 + $0x40] sm:$0xff]  ;;  %v661_v33 = vld [vmem:[%s1553_s10 + $0x18] sm:$0xff]  ;;  %v659_v35 = vld [vmem:[%s1553_s10 + $0x8] sm:$0xff] }
  0x97   : > { %456 = vmatprep.subr.mxu0 %v383_v30  ;;  %591 = vmatprep.subr.mxu1 %v530_v43  ;;  %v664_v30 = vld [vmem:[%s1553_s10 + $0x30] sm:$0xff]  ;;  %v721_v37 = vld [vmem:[%s1553_s10 + $0x1f8] sm:$0xff]  ;;  %v719_v39 = vld [vmem:[%s1553_s10 + $0x1e8] sm:$0xff] }
  0x98   : > { %457 = vmatpush2.msra.mxu0 %v382_v32  ;;  %592 = vmatpush2.msra.mxu1 %v529_v45  ;;  %v662_v32 = vld [vmem:[%s1553_s10 + $0x20] sm:$0xff]  ;;  %v717_v41 = vld [vmem:[%s1553_s10 + $0x1d8] sm:$0xff]  ;;  %v715_v43 = vld [vmem:[%s1553_s10 + $0x1c8] sm:$0xff] }
  0x99   : > { %458 = vmatprep.subr.mxu0 %v381_v34  ;;  %593 = vmatprep.subr.mxu1 %v528_v47  ;;  %v660_v34 = vld [vmem:[%s1553_s10 + $0x10] sm:$0xff]  ;;  %v713_v45 = vld [vmem:[%s1553_s10 + $0x1b8] sm:$0xff]  ;;  %v711_v47 = vld [vmem:[%s1553_s10 + $0x1a8] sm:$0xff] }
  0x9a   : > { %459 = vmatpush2.msra.mxu0 %v380_v36  ;;  %594 = vmatpush2.msra.mxu1 %v527_v49  ;;  %v658_v36 = vld [vmem:[%s1553_s10] sm:$0xff]  ;;  %v709_v49 = vld [vmem:[%s1553_s10 + $0x198] sm:$0xff] }
  0x9b   : > { %460 = vmatprep.subr.mxu0 %v379_v38  ;;  %595 = vmatprep.subr.mxu1 %v526_v51  ;;  %v720_v38 = vld [vmem:[%s1553_s10 + $0x1f0] sm:$0xff]  ;;  %v707_v51 = vld [vmem:[%s1553_s10 + $0x188] sm:$0xff] }
  0x9c   : > { %461 = vmatpush2.msra.mxu0 %v378_v40  ;;  %596 = vmatpush2.msra.mxu1 %v525_v53  ;;  %v718_v40 = vld [vmem:[%s1553_s10 + $0x1e0] sm:$0xff]  ;;  %v705_v53 = vld [vmem:[%s1553_s10 + $0x178] sm:$0xff] }
  0x9d   : > { %462 = vmatprep.subr.mxu0 %v377_v42  ;;  %597 = vmatprep.subr.mxu1 %v524_v55  ;;  %v716_v42 = vld [vmem:[%s1553_s10 + $0x1d0] sm:$0xff]  ;;  %v703_v55 = vld [vmem:[%s1553_s10 + $0x168] sm:$0xff] }
  0x9e   : > { %463 = vmatpush2.msra.mxu0 %v376_v44  ;;  %598 = vmatpush2.msra.mxu1 %v523_v57  ;;  %v714_v44 = vld [vmem:[%s1553_s10 + $0x1c0] sm:$0xff]  ;;  %v701_v57 = vld [vmem:[%s1553_s10 + $0x158] sm:$0xff] }
  0x9f   : > { %464 = vmatprep.subr.mxu0 %v375_v46  ;;  %599 = vmatprep.subr.mxu1 %v522_v58  ;;  %v712_v46 = vld [vmem:[%s1553_s10 + $0x1b0] sm:$0xff] }
  0xa0   : > { %465 = vmatpush2.msra.mxu0 %v374_v48  ;;  %609 = vmatprep.mubr.f32.mxu1 %v1634_v11  ;;  %v513_v11 = vld [vmem:[%s1551_s25 + $0x100] sm:$0xff]  ;;  %v700_v58 = vld [vmem:[%s1553_s10 + $0x150] sm:$0xff] }
  0xa1   : > { %466 = vmatprep.subr.mxu0 %v373_v50  ;;  %600 = vmatpush2.msra.mxu1 %v521_v59  ;;  %v710_v48 = vld [vmem:[%s1553_s10 + $0x1a0] sm:$0xff]  ;;  %v708_v50 = vld [vmem:[%s1553_s10 + $0x190] sm:$0xff]  ;;  %v699_v59 = vld [vmem:[%s1553_s10 + $0x148] sm:$0xff] }
  0xa2   : > { %467 = vmatpush2.msra.mxu0 %v372_v52  ;;  %601 = vmatprep.subr.mxu1 %v520_v62  ;;  %v706_v52 = vld [vmem:[%s1553_s10 + $0x180] sm:$0xff]  ;;  %v696_v62 = vld [vmem:[%s1553_s10 + $0x130] sm:$0xff] }
  0xa3   : > { %469 = vmatmul.mubr.f32.vlgmr.msra.gmra.mxu0 %v336_v54  ;;  %722 = vmatprep.subr.mxu0 %v689_v60 }
  0xa4   : > { %474 = vmatprep.mubr.f32.mxu0 %v339_v56  ;;  %602 = vmatpush2.msra.mxu1 %v519_v63  ;;  %v695_v63 = vld [vmem:[%s1553_s10 + $0x128] sm:$0xff] }
  0xa5   : > { %723 = vmatpush1.msra.mxu0 %v688_v0  ;;  %603 = vmatprep.subr.mxu1 %v518_v1  ;;  %v693_v1 = vld [vmem:[%s1553_s10 + $0x118] sm:$0xff] }
  0xa6   : > { %724 = vmatprep.subr.mxu0 %v687_v2  ;;  %604 = vmatpush2.msra.mxu1 %v517_v3  ;;  %v691_v3 = vld [vmem:[%s1553_s10 + $0x108] sm:$0xff] }
  0xa7   : > { %475 = vmatmul.mubr.f32.gmra.mxu0 %v338_v61  ;;  %605 = vmatprep.subr.mxu1 %v516_v5 }
  0xa8   : > { %725 = vmatpush1.msra.mxu0 %v686_v4  ;;  %606 = vmatpush2.msra.mxu1 %v515_v7 }
  0xa9   : > { %726 = vmatprep.subr.mxu0 %v685_v6  ;;  %607 = vmatprep.subr.mxu1 %v514_v9 }
  0xaa   : > { %727 = vmatpush1.msra.mxu0 %v684_v8  ;;  %608 = vmatpush2.msra.mxu1 %v513_v11 }
  0xab   : > { %728 = vmatprep.subr.mxu0 %v683_v10  ;;  %610 = vmatmul.mubr.f32.vlgmr.msra.gmra.mxu1 %v336_v54  ;;  %v704_v54 = vld [vmem:[%s1553_s10 + $0x170] sm:$0xff] }
  0xac   : > { %729 = vmatpush1.msra.mxu0 %v682_v12  ;;  %983 = vmatprep.subr.mxu1 %v689_v60  ;;  %v698_v60 = vld [vmem:[%s1553_s10 + $0x140] sm:$0xff] }
  0xad   : > { %615 = vmatprep.mubr.f32.mxu1 %v339_v56  ;;  %1015 = vmatpush1.msra.mxu1 %v688_v0  ;;  %v702_v56 = vld [vmem:[%s1553_s10 + $0x160] sm:$0xff] }
  0xae   : > { %984 = vmatprep.subr.mxu1 %v687_v2  ;;  %730 = vmatprep.subr.mxu0 %v681_v13  ;;  %v694_v0 = vld [vmem:[%s1553_s10 + $0x120] sm:$0xff]  ;;  %v692_v2 = vld [vmem:[%s1553_s10 + $0x110] sm:$0xff] }
  0xaf   : > { %1016 = vmatpush1.msra.mxu1 %v686_v4  ;;  %731 = vmatpush1.msra.mxu0 %v680_v14  ;;  %v690_v4 = vld [vmem:[%s1553_s10 + $0x100] sm:$0xff] }
  0xb0   : > { %616 = vmatmul.mubr.f32.gmra.mxu1 %v338_v61  ;;  %985 = vmatprep.subr.mxu1 %v685_v6  ;;  %v697_v61 = vld [vmem:[%s1553_s10 + $0x138] sm:$0xff] }
  0xb1   : > { %1017 = vmatpush1.msra.mxu1 %v684_v8  ;;  %732 = vmatprep.subr.mxu0 %v679_v15 }
  0xb2   : > { %986 = vmatprep.subr.mxu1 %v683_v10  ;;  %733 = vmatpush1.msra.mxu0 %v678_v16 }
  0xb3   : > { %1018 = vmatpush1.msra.mxu1 %v682_v12  ;;  %734 = vmatprep.subr.mxu0 %v677_v17 }
  0xb4   : > { %987 = vmatprep.subr.mxu1 %v681_v13  ;;  %735 = vmatpush1.msra.mxu0 %v676_v18 }
  0xb5   : > { %1019 = vmatpush1.msra.mxu1 %v680_v14  ;;  %736 = vmatprep.subr.mxu0 %v675_v19 }
  0xb6   : > { %988 = vmatprep.subr.mxu1 %v679_v15  ;;  %737 = vmatpush1.msra.mxu0 %v674_v20 }
  0xb7   : > { %1020 = vmatpush1.msra.mxu1 %v678_v16  ;;  %738 = vmatprep.subr.mxu0 %v673_v21 }
  0xb8   : > { %989 = vmatprep.subr.mxu1 %v677_v17  ;;  %739 = vmatpush1.msra.mxu0 %v672_v22 }
  0xb9   : > { %1021 = vmatpush1.msra.mxu1 %v676_v18  ;;  %740 = vmatprep.subr.mxu0 %v671_v23 }
  0xba   : > { %990 = vmatprep.subr.mxu1 %v675_v19  ;;  %741 = vmatpush1.msra.mxu0 %v670_v24 }
  0xbb   : > { %1022 = vmatpush1.msra.mxu1 %v674_v20  ;;  %742 = vmatprep.subr.mxu0 %v669_v25 }
  0xbc   : > { %991 = vmatprep.subr.mxu1 %v673_v21  ;;  %743 = vmatpush1.msra.mxu0 %v668_v26 }
  0xbd   : > { %1023 = vmatpush1.msra.mxu1 %v672_v22  ;;  %744 = vmatprep.subr.mxu0 %v667_v27 }
  0xbe   : > { %992 = vmatprep.subr.mxu1 %v671_v23  ;;  %745 = vmatpush1.msra.mxu0 %v666_v28 }
  0xbf   : > { %1024 = vmatpush1.msra.mxu1 %v670_v24  ;;  %746 = vmatprep.subr.mxu0 %v665_v29 }
  0xc0   : > { %993 = vmatprep.subr.mxu1 %v669_v25  ;;  %747 = vmatpush1.msra.mxu0 %v664_v30 }
  0xc1   : > { %1025 = vmatpush1.msra.mxu1 %v668_v26  ;;  %748 = vmatprep.subr.mxu0 %v663_v31 }
  0xc2   : > { %994 = vmatprep.subr.mxu1 %v667_v27  ;;  %749 = vmatpush1.msra.mxu0 %v662_v32 }
  0xc3   : > { %1026 = vmatpush1.msra.mxu1 %v666_v28  ;;  %750 = vmatprep.subr.mxu0 %v661_v33 }
  0xc4   : > { %995 = vmatprep.subr.mxu1 %v665_v29  ;;  %751 = vmatpush1.msra.mxu0 %v660_v34 }
  0xc5   : > { %1027 = vmatpush1.msra.mxu1 %v664_v30  ;;  %752 = vmatprep.subr.mxu0 %v659_v35 }
  0xc6   : > { %996 = vmatprep.subr.mxu1 %v663_v31  ;;  %753 = vmatpush1.msra.mxu0 %v658_v36 }
  0xc7   : > { %1028 = vmatpush1.msra.mxu1 %v662_v32  ;;  %754 = vmatprep.subr.mxu0 %v721_v37 }
  0xc8   : > { %997 = vmatprep.subr.mxu1 %v661_v33  ;;  %755 = vmatpush2.msra.mxu0 %v720_v38 }
  0xc9   : > { %1029 = vmatpush1.msra.mxu1 %v660_v34  ;;  %756 = vmatprep.subr.mxu0 %v719_v39 }
  0xca   : > { %998 = vmatprep.subr.mxu1 %v659_v35  ;;  %757 = vmatpush2.msra.mxu0 %v718_v40 }
  0xcb   : > { %1030 = vmatpush1.msra.mxu1 %v658_v36  ;;  %758 = vmatprep.subr.mxu0 %v717_v41 }
  0xcc   : > { %999 = vmatprep.subr.mxu1 %v721_v37  ;;  %759 = vmatpush2.msra.mxu0 %v716_v42  ;;  %v654_v37 = vld [vmem:[#allocation2 + $0x10] sm:$0xff] }
  0xcd   : > { %1031 = vmatpush2.msra.mxu1 %v720_v38  ;;  %760 = vmatprep.subr.mxu0 %v715_v43 }
  0xce   : > { %1000 = vmatprep.subr.mxu1 %v719_v39  ;;  %761 = vmatpush2.msra.mxu0 %v714_v44  ;;  %v655_v39 = vld [vmem:[#allocation2] sm:$0xff] }
  0xcf   : > { %1032 = vmatpush2.msra.mxu1 %v718_v40  ;;  %762 = vmatprep.subr.mxu0 %v713_v45 }
  0xd0   : > { %1001 = vmatprep.subr.mxu1 %v717_v41  ;;  %763 = vmatpush2.msra.mxu0 %v712_v46 }
  0xd1   : > { %1033 = vmatpush2.msra.mxu1 %v716_v42  ;;  %764 = vmatprep.subr.mxu0 %v711_v47  ;;  %v656_v42 = vld [vmem:[#allocation2 + $0x18] sm:$0xff] }
  0xd2   : > { %1002 = vmatprep.subr.mxu1 %v715_v43  ;;  %765 = vmatpush2.msra.mxu0 %v710_v48 }
  0xd3   : > { %1034 = vmatpush2.msra.mxu1 %v714_v44  ;;  %766 = vmatprep.subr.mxu0 %v709_v49 }
  0xd4   : > { %1003 = vmatprep.subr.mxu1 %v713_v45  ;;  %767 = vmatpush2.msra.mxu0 %v708_v50  ;;  %v657_v45 = vld [vmem:[#allocation2 + $0x8] sm:$0xff] }
  0xd5   : > { %1035 = vmatpush2.msra.mxu1 %v712_v46  ;;  %768 = vmatprep.subr.mxu0 %v707_v51 }
  0xd6   : > { %1004 = vmatprep.subr.mxu1 %v711_v47  ;;  %769 = vmatpush2.msra.mxu0 %v706_v52 }
  0xd7   : > { %1036 = vmatpush2.msra.mxu1 %v710_v48  ;;  %770 = vmatprep.subr.mxu0 %v705_v53 }
  0xd8   : > { %1005 = vmatprep.subr.mxu1 %v709_v49  ;;  %771 = vmatpush2.msra.mxu0 %v704_v54 }
  0xd9   : > { %1037 = vmatpush2.msra.mxu1 %v708_v50  ;;  %772 = vmatprep.subr.mxu0 %v703_v55 }
  0xda   : > { %1006 = vmatprep.subr.mxu1 %v707_v51  ;;  %773 = vmatpush2.msra.mxu0 %v702_v56 }
  0xdb   : > { %1038 = vmatpush2.msra.mxu1 %v706_v52  ;;  %774 = vmatprep.subr.mxu0 %v701_v57 }
  0xdc   : > { %1007 = vmatprep.subr.mxu1 %v705_v53  ;;  %775 = vmatpush2.msra.mxu0 %v700_v58 }
  0xdd   : > { %1039 = vmatpush2.msra.mxu1 %v704_v54  ;;  %776 = vmatprep.subr.mxu0 %v699_v59 }
  0xde   : > { %1008 = vmatprep.subr.mxu1 %v703_v55  ;;  %777 = vmatpush2.msra.mxu0 %v698_v60 }
  0xdf   : > { %1040 = vmatpush2.msra.mxu1 %v702_v56  ;;  %778 = vmatprep.subr.mxu0 %v697_v61 }
  0xe0   : > { %1009 = vmatprep.subr.mxu1 %v701_v57  ;;  %779 = vmatpush2.msra.mxu0 %v696_v62 }
  0xe1   : > { %1041 = vmatpush2.msra.mxu1 %v700_v58  ;;  %780 = vmatprep.subr.mxu0 %v695_v63 }
  0xe2   : > { %1010 = vmatprep.subr.mxu1 %v699_v59  ;;  %781 = vmatpush2.msra.mxu0 %v694_v0 }
  0xe3   : > { %1042 = vmatpush2.msra.mxu1 %v698_v60  ;;  %782 = vmatprep.subr.mxu0 %v693_v1 }
  0xe4   : > { %1011 = vmatprep.subr.mxu1 %v697_v61  ;;  %783 = vmatpush2.msra.mxu0 %v692_v2 }
  0xe5   : > { %1043 = vmatpush2.msra.mxu1 %v696_v62  ;;  %784 = vmatprep.subr.mxu0 %v691_v3 }
  0xe6   : > { %1012 = vmatprep.subr.mxu1 %v695_v63  ;;  %785 = vmatpush2.msra.mxu0 %v690_v4 }
  0xe7   : > { %1044 = vmatpush2.msra.mxu1 %v694_v0 }
  0xe8   : > { %1013 = vmatprep.subr.mxu1 %v693_v1 }
  0xe9   : > { %1045 = vmatpush2.msra.mxu1 %v692_v2 }
  0xea   : > { %1014 = vmatprep.subr.mxu1 %v691_v3 }
  0xeb   : > { %1046 = vmatpush2.msra.mxu1 %v690_v4 }
 0x163   : > { %v470_v5 = vpop.f32.mrf.mxu0 }
 0x164   : > { %v970_v6 = vmul.f32 -1.442695, %v470_v5 }
 0x165   : > { %v472_v7 = vpop.f32.mrf.mxu0 }
 0x166   : > { %1136 = vpow2.f32 %v970_v6  ;;  %v971_v8 = vmul.f32 -1.442695, %v472_v7 }
 0x167   : > { %v476_v9 = vpop.f32.mrf.mxu0 }
 0x168   : > { %1138 = vpow2.f32 %v971_v8  ;;  %v972_v10 = vmul.f32 -1.442695, %v476_v9 }
 0x169   : > { %v478_v11 = vpop.f32.mrf.mxu0 }
 0x16a   : > { %1140 = vpow2.f32 %v972_v10  ;;  %v973_v12 = vmul.f32 -1.442695, %v478_v11 }
 0x16b   : > { %v611_v21 = vpop.f32.mrf.mxu1 }
 0x16c   : > { %1142 = vpow2.f32 %v973_v12 }
 0x16d   : > { %v613_v23 = vpop.f32.mrf.mxu1 }
 0x170   : > { %v617_v28 = vpop.f32.mrf.mxu1 }
 0x172   : > { %v619_v34 = vpop.f32.mrf.mxu1 }
 0x173   : > { %v1137_v13 = vpop.eup %1136 }
 0x174   : > { %v634_v14 = vadd.f32 1.0, %v1137_v13 }
 0x175   : > { %v1139_v15 = vpop.eup %1138 }
 0x176   : > { %1144 = vrcp.f32 %v634_v14  ;;  %v635_v16 = vadd.f32 1.0, %v1139_v15 }
 0x177   : > { %v1141_v17 = vpop.eup %1140 }
 0x178   : > { %1146 = vrcp.f32 %v635_v16  ;;  %v636_v18 = vadd.f32 1.0, %v1141_v17 }
 0x179   : > { %v1143_v19 = vpop.eup %1142 }
 0x17a   : > { %1148 = vrcp.f32 %v636_v18  ;;  %v637_v20 = vadd.f32 1.0, %v1143_v19 }
 0x17c   : > { %1150 = vrcp.f32 %v637_v20 }
 0x183   : > { %v1145_v22 = vpop.eup %1144 }
 0x184   : > { %v646_v25 = vmul.f32 %v1145_v22, %v470_v5 }
 0x185   : > { %v1147_v24 = vpop.eup %1146 }
 0x186   : > { %v647_v26 = vmul.f32 %v1147_v24, %v472_v7  ;;  %v650_v32 = vmul.f32 %v646_v25, %v611_v21 }
 0x187   : > { %v1149_v27 = vpop.eup %1148 }
 0x188   : > { %v651_v29 = vmul.f32 %v647_v26, %v613_v23  ;;  %v648_v31 = vmul.f32 %v1149_v27, %v476_v9 }
 0x189   : > { %v1151_v30 = vpop.eup %1150 }
 0x18a   : > { %v649_v33 = vmul.f32 %v1151_v30, %v478_v11  ;;  %786 = vmatprep.mubr.f32.mxu0 %v651_v29  ;;  %v652_v36 = vmul.f32 %v648_v31, %v617_v28 }
 0x18b   : > { %787 = vmatmul.mubr.f32.vlgmr.msra.gmra.mxu0 %v650_v32 }
 0x18c   : > { %v653_v35 = vmul.f32 %v649_v33, %v619_v34 }
 0x18e   : > { %792 = vmatprep.mubr.f32.mxu1 %v653_v35 }
 0x18f   : > { %793 = vmatmul.mubr.f32.vlgmr.msra.gmra.mxu1 %v652_v36 }
 0x24b   : > { %v788_v38 = vpop.f32.mrf.mxu0 }
 0x24c   : > { %v799_v40 = vadd.f32 %v788_v38, %v654_v37 }
 0x24d   : > { %v790_v41 = vpop.f32.mrf.mxu0 }
 0x24e   : > { %803 = vst [vmem:[#allocation2 + $0x10] sm:$0xff] %v799_v40  ;;  %v800_v43 = vadd.f32 %v790_v41, %v655_v39 }
 0x24f   : > { %v794_v44 = vpop.f32.mrf.mxu1 }
 0x250   : > { %804 = vst [vmem:[#allocation2] sm:$0xff] %v800_v43  ;;  %v801_v46 = vadd.f32 %v794_v44, %v656_v42  ;;  %810 = sbr.rel (%p974_p7) target bundleno = 605 (0x25d), region = 60 }
 0x251   : > { %v796_v47 = vpop.f32.mrf.mxu1 }
 0x252   : > { %805 = vst [vmem:[#allocation2 + $0x18] sm:$0xff] %v801_v46  ;;  %v802_v48 = vadd.f32 %v796_v47, %v657_v45 }
 0x254   : > { %806 = vst [vmem:[#allocation2 + $0x8] sm:$0xff] %v802_v48 }
 0x255   : > { %v811_v49 = vld [vmem:[#allocation2 + $0x10] sm:$0xff] }
 0x256   : > { %815 = vst [vmem:[#allocation11] sm:$0xff] %v811_v49 }
 0x257   : > { %v812_v50 = vld [vmem:[#allocation2] sm:$0xff] }
 0x258   : > { %816 = vst [vmem:[#allocation11 + $0x8] sm:$0xff] %v812_v50 }
 0x259   : > { %v813_v51 = vld [vmem:[#allocation2 + $0x18] sm:$0xff] }
 0x25a   : > { %817 = vst [vmem:[#allocation11 + $0x10] sm:$0xff] %v813_v51 }
 0x25b   : > { %v814_v52 = vld [vmem:[#allocation2 + $0x8] sm:$0xff] }
 0x25c   : > { %818 = vst [vmem:[#allocation11 + $0x18] sm:$0xff] %v814_v52 }
 0x25d PF: > { %p1078_p2 = scmp.eq.s32.totalorder %s1469_s5, 1  ;;  %s1358_s7 = smov [#allocation11]  }
 0x25e   : > { %s829_s11 = sshll.u32 %s1358_s7, 4  ;;  %s830_s11 = int_to_ptr.vmem [resolvable:$true] %s829_s11 }
 0x25f   : > { %s1262_s23 = scalar_lea.vmem %s830_s11, 512  ;;  %p1269_p4 = scmp.lt.s32.totalorder %s830_s11, %s830_s11 }
 0x260   : > { %p1263_p5 = scmp.ne.s32.totalorder %s830_s11, %s1262_s23  ;;  %p1270_p9 = scmp.lt.s32.totalorder %s1262_s23, %s1262_s23 }
 0x262   : > { %p1264_p8 = pnand %p1263_p5, %p1078_p2  ;;  %p1271_p11 = por %p1270_p9, %p1269_p4 }
 0x264   : > { %p1265_p3 = pneg %p1264_p8 }
 0x266   : > { %p1272_p12 = pnand %p1271_p11, %p1265_p3 }
 0x268   : > { %1275 = shalt.err (!%p1272_p12)
}
 0x269   : > { %s1359_s18 = smov 256   ;;  %s1360_s24 = smov 16  }
 0x26a   : > { %1058 = dma.vmem_to_hbm [thread:$0]  (%p1078_p2), %s830_s11, 512, %s1791_s4, [#allocation5], %s1359_s18, %s1359_s18, %s1360_s24  }
 0x26b   : > { %1323 = dma.done.wait (%p1078_p2), [#allocation5], 512  }
 0x26c   : > { %1325 = vsyncadd (%p1078_p2), [#allocation5], 4294966784 }
 0x26d PF: > { %s22_s20 = sadd.s32 1, %s1348_s20   ;;  %s1797_s15 = smov %s1332_s16 }
 0x26e   : > { %p19_p10 = scmp.ge.s32.totalorder %s22_s20, 4   ;;  %s1798_s16 = smov %s1336_s17 }
 0x26f   : > { %s1799_s17 = smov %s1433_s27  ;;  %s1800_s18 = smov %s1344_s19 }
 0x270   : > { %s1801_s19 = smov %s1803_s21  ;;  %21 = sbr.rel (!%p19_p10) target bundleno = 8 (0x8), region = 112 }
 0x275   :  { %845 = vsyncpa [#allocation4], 1 }
 0x276   :  { %847 = vsyncpa [#allocation4 + $0x1], 1 }
 0x277   :  { %848 = vsyncpa [#allocation7], 1 }
 0x278   :  { %850 = vsyncpa [#allocation7 + $0x1], 1 }
 0x279   :  { %851 = vsyncpa [#allocation10], 1 }
 0x27a   :  { %853 = vsyncpa [#allocation10 + $0x1], 1 }
 0x27b   :  { %854 = vsyncpa [#allocation5], 1 }
 0x27c   :  { %856 = vsyncpa [#allocation5 + $0x1], 1 }

</bundles_post_ra>
